<compile_context>
chip_gen: v7x
topology: tpu7x:2x2x1
jax: 0.10.0
libtpu: 0.0.40
codegen_flags: <defaults>
</compile_context>

<pallas_src>
import jax
import jax.numpy as jnp
from jax.experimental import pallas as pl
from jax.experimental.pallas import tpu as pltpu

BN_EPS = 1e-5  # torch.nn.BatchNorm1d default eps


# ------------------------------ fused kernel --------------------------------

def fused_pdn_kernel(x_ref, ea_ref, s_ref, t_ref, tt_ref,
                     w1t_ref, b1_ref, w2blk_ref, b2_ref,
                     w0t_ref, b0_ref, wht_ref, bh_ref,
                     mask_ref, lint_ref, linb_ref,
                     o_ref):
    """Whole PDN forward pass in one kernel (no grid, whole arrays in VMEM)."""
    n_hidden = wht_ref.shape[0]
    num_graphs = mask_ref.shape[1]

    S = s_ref[...]        # [E, N] one-hot(source)
    T = t_ref[...]        # [E, N] one-hot(target)
    Tt = tt_ref[...]      # [N, E] = T^T (precomputed to avoid in-kernel transpose)

    # ---- edge gates for ALL layers in one lane-dense pass: gates [E, L] ----
    # H = relu(edge_attr @ W1_cat^T + b1_cat); Z = H @ blockdiag(W2_l) + b2
    h = jnp.dot(ea_ref[...], w1t_ref[...],
                preferred_element_type=jnp.float32) + b1_ref[...]
    h = jnp.maximum(h, 0.0)
    gates = jax.nn.sigmoid(
        jnp.dot(h, w2blk_ref[...], preferred_element_type=jnp.float32) + b2_ref[...])

    # ---- gcn_norm (add_self_loops=True, self-loop weight 1) for all layers --
    deg = jnp.dot(Tt, gates, preferred_element_type=jnp.float32) + 1.0      # [N, L]
    dinv = jnp.where(deg > 0.0, jax.lax.rsqrt(deg), 0.0)                     # [N, L]
    dinv_row = jnp.dot(S, dinv, preferred_element_type=jnp.float32)          # [E, L]
    dinv_col = jnp.dot(T, dinv, preferred_element_type=jnp.float32)          # [E, L]
    norm = dinv_row * gates * dinv_col                                       # [E, L]
    self_norm = dinv * dinv                                                  # [N, L]

    def pdn_conv(xin, wt, b, layer):
        # out[i] = sum_{e: dst(e)=i} norm_e * (x W^T)[src(e)] + selfnorm_i*(x W^T)[i] + b
        xl = jnp.dot(xin, wt, preferred_element_type=jnp.float32)            # [N, C]
        msg = jnp.dot(S, xl, preferred_element_type=jnp.float32)             # [E, C]
        msg = msg * norm[:, layer:layer + 1]
        agg = jnp.dot(Tt, msg, preferred_element_type=jnp.float32)           # [N, C]
        return agg + self_norm[:, layer:layer + 1] * xl + b

    # conv1
    x = pdn_conv(x_ref[...], w0t_ref[...], b0_ref[...], 0)
    x0 = x

    # hidden layers: BatchNorm(train batch stats, identity affine) -> ReLU -> PDNConv
    for i in range(n_hidden):
        mean = jnp.mean(x, axis=0, keepdims=True)
        var = jnp.mean((x - mean) ** 2, axis=0, keepdims=True)
        xn = jnp.maximum((x - mean) * jax.lax.rsqrt(var + BN_EPS), 0.0)
        x = pdn_conv(xn, wht_ref[i], bh_ref[i], 1 + i)

    # skip connection + relu
    x1 = jnp.maximum(x + x0, 0.0)

    # global max pool per graph + final Linear head.
    # x1 >= 0 so masked-multiply max equals the true per-graph max (graphs non-empty).
    mask = mask_ref[...]          # [N, G]
    lint = lint_ref[...]          # [C, num_classes]
    linb = linb_ref[...]          # [1, num_classes]
    for g in range(num_graphs):
        pooled = jnp.max(x1 * mask[:, g:g + 1], axis=0, keepdims=True)       # [1, C]
        o_ref[g:g + 1, :] = (jnp.dot(pooled, lint,
                                     preferred_element_type=jnp.float32) + linb)


# ------------------------------ model pieces --------------------------------

def _init_linear(key, out_dim, in_dim, scale=0.1):
    kw, kb = jax.random.split(key)
    w = scale * jax.random.normal(kw, (out_dim, in_dim), jnp.float32)
    b = scale * jax.random.normal(kb, (out_dim,), jnp.float32)
    return w, b


def init_pdn_conv(key, in_ch, out_ch, edge_dim, edge_hidden):
    k1, k2, k3, k4 = jax.random.split(key, 4)
    lin_w = 0.1 * jax.random.normal(k1, (out_ch, in_ch), jnp.float32)  # lin has no bias
    bias = 0.1 * jax.random.normal(k2, (out_ch,), jnp.float32)
    mlp_w1, mlp_b1 = _init_linear(k3, edge_hidden, edge_dim)
    mlp_w2, mlp_b2 = _init_linear(k4, 1, edge_hidden)
    return dict(lin_w=lin_w, bias=bias,
                mlp_w1=mlp_w1, mlp_b1=mlp_b1, mlp_w2=mlp_w2, mlp_b2=mlp_b2)


def forward(params, x, edge_index, edge_attr, batch, num_graphs):
    """Wrapper: builds one-hot incidence operators + stacked weights (once),
    then runs the single fused Pallas kernel."""
    N = x.shape[0]
    convs = [params['conv1']] + list(params['hidden_1'])

    # One-hot graph operators shared by every layer (edge_index is fixed).
    row, col = edge_index[0], edge_index[1]
    S = jax.nn.one_hot(row, N, dtype=jnp.float32)                 # [E, N] source
    T = jax.nn.one_hot(col, N, dtype=jnp.float32)                 # [E, N] target
    Tt = T.T                                                      # [N, E]
    mask = jax.nn.one_hot(batch, num_graphs, dtype=jnp.float32)   # [N, G]

    # Stacked edge-MLP params -> one lane-dense gate matmul for all layers.
    w1t = jnp.concatenate([c['mlp_w1'].T for c in convs], axis=1)           # [edge_dim, L*H]
    b1 = jnp.concatenate([c['mlp_b1'] for c in convs])[None, :]             # [1, L*H]
    w2blk = jax.scipy.linalg.block_diag(*[c['mlp_w2'].T for c in convs])    # [L*H, L]
    b2 = jnp.stack([c['mlp_b2'][0] for c in convs])[None, :]                # [1, L]

    # Conv weights (conv1 separate because of the different input width).
    w0t = params['conv1']['lin_w'].T                                        # [F_in, C]
    b0 = params['conv1']['bias'][None, :]                                   # [1, C]
    wht = jnp.stack([p['lin_w'].T for p in params['hidden_1']])             # [Lh, C, C]
    bh = jnp.stack([p['bias'][None, :] for p in params['hidden_1']])        # [Lh, 1, C]

    lint = params['lin_w'].T                                                # [C, ncls]
    linb = params['lin_b'][None, :]                                         # [1, ncls]
    num_classes = params['lin_w'].shape[0]

    # TODO(synk): F.dropout(x_out, p, training=self.training) is treated as
    # identity (module assumed in eval mode).
    vmem = pl.BlockSpec(memory_space=pltpu.MemorySpace.VMEM)
    return pl.pallas_call(
        fused_pdn_kernel,
        out_shape=jax.ShapeDtypeStruct((num_graphs, num_classes), jnp.float32),
        in_specs=[vmem] * 16,
        out_specs=vmem,
    )(x, edge_attr, S, T, Tt, w1t, b1, w2blk, b2, w0t, b0, wht, bh, mask, lint, linb)


# ---------------------- plain-JAX reference (torch semantics) ---------------

def reference_forward(params, x, edge_index, edge_attr, batch, num_graphs):
    N = x.shape[0]

    def pdn_conv(h, p):
        hh = jnp.maximum(edge_attr @ p['mlp_w1'].T + p['mlp_b1'][None, :], 0.0)
        w_e = jax.nn.sigmoid(hh @ p['mlp_w2'].T + p['mlp_b2'][None, :])[:, 0]
        row, col = edge_index[0], edge_index[1]
        loops = jnp.arange(N, dtype=edge_index.dtype)
        row_a = jnp.concatenate([row, loops])
        col_a = jnp.concatenate([col, loops])
        w_a = jnp.concatenate([w_e, jnp.ones((N,), jnp.float32)])
        deg = jnp.zeros((N,), jnp.float32).at[col_a].add(w_a)
        dinv = jnp.where(deg > 0, jax.lax.rsqrt(deg), 0.0)
        norm = dinv[row_a] * w_a * dinv[col_a]
        xl = h @ p['lin_w'].T
        out = jnp.zeros((N, xl.shape[1]), jnp.float32).at[col_a].add(
            norm[:, None] * xl[row_a])
        return out + p['bias'][None, :]

    h = pdn_conv(x, params['conv1'])
    h0 = h
    for p in params['hidden_1']:
        mean = h.mean(0, keepdims=True)
        var = ((h - mean) ** 2).mean(0, keepdims=True)
        h = jnp.maximum((h - mean) * jax.lax.rsqrt(var + BN_EPS), 0.0)
        h = pdn_conv(h, p)
    h1 = jnp.maximum(h + h0, 0.0)
    member = batch[None, :] == jnp.arange(num_graphs)[:, None]              # [G, N]
    pooled = jnp.max(jnp.where(member[:, :, None], h1[None, :, :], -jnp.inf), axis=1)
    return pooled @ params['lin_w'].T + params['lin_b'][None, :]


# ----------------------------------- main -----------------------------------

if __name__ == "__main__":
    NUM_NODE_FEATURES = 8
    OUT_CHANNELS = 16
    NUM_EDGE_FEATURES = 4      # also the edge-MLP hidden width in PDNConv
    NUM_CLASSES = 3
    N_HIDDEN_LAYERS = 1
    N_NODES = 20
    N_EDGES = 40
    NUM_GRAPHS = 2

    key = jax.random.PRNGKey(0)
    keys = jax.random.split(key, 8)

    # Deterministic synthetic inputs
    x = jax.random.normal(keys[0], (N_NODES, NUM_NODE_FEATURES), jnp.float32)
    edge_attr = jax.random.normal(keys[1], (N_EDGES, NUM_EDGE_FEATURES), jnp.float32)
    src = jax.random.randint(keys[2], (N_EDGES,), 0, N_NODES)
    off = jax.random.randint(keys[3], (N_EDGES,), 1, N_NODES)
    dst = (src + off) % N_NODES                      # guarantees no self-loops
    edge_index = jnp.stack([src, dst]).astype(jnp.int32)
    batch = jnp.concatenate([jnp.zeros(N_NODES // 2, jnp.int32),
                             jnp.ones(N_NODES - N_NODES // 2, jnp.int32)])

    # Deterministic parameter init
    pk = jax.random.split(keys[5], 3)
    params = {
        'conv1': init_pdn_conv(pk[0], NUM_NODE_FEATURES, OUT_CHANNELS,
                               NUM_EDGE_FEATURES, NUM_EDGE_FEATURES),
        'hidden_1': [init_pdn_conv(k, OUT_CHANNELS, OUT_CHANNELS,
                                   NUM_EDGE_FEATURES, NUM_EDGE_FEATURES)
                     for k in jax.random.split(pk[1], N_HIDDEN_LAYERS)],
    }
    params['lin_w'], params['lin_b'] = _init_linear(pk[2], NUM_CLASSES, OUT_CHANNELS)

    fwd = jax.jit(forward, static_argnums=(5,))
    out = fwd(params, x, edge_index, edge_attr, batch, NUM_GRAPHS)
    out = jax.block_until_ready(out)
    assert out.shape == (NUM_GRAPHS, NUM_CLASSES)
    assert bool(jnp.all(jnp.isfinite(out)))

    # Correctness check against a plain-JAX implementation of the torch module.
    with jax.default_matmul_precision('highest'):
        ref = reference_forward(params, x, edge_index, edge_attr, batch, NUM_GRAPHS)
    ref = jax.block_until_ready(ref)
    max_err = float(jnp.max(jnp.abs(out - ref)))
    assert max_err < 2e-2, f"mismatch vs reference: {max_err}"

    print("KERNEL_OK")
</pallas_src>

<mosaic_0001>
module attributes {stable_mosaic.version = 11 : i64} {
  func.func @fused_pdn_kernel(%arg0: memref<20x8xf32, #tpu.memory_space<vmem>>, %arg1: memref<40x4xf32, #tpu.memory_space<vmem>>, %arg2: memref<40x20xf32, #tpu.memory_space<vmem>>, %arg3: memref<40x20xf32, #tpu.memory_space<vmem>>, %arg4: memref<20x40xf32, #tpu.memory_space<vmem>>, %arg5: memref<4x8xf32, #tpu.memory_space<vmem>>, %arg6: memref<1x8xf32, #tpu.memory_space<vmem>>, %arg7: memref<8x2xf32, #tpu.memory_space<vmem>>, %arg8: memref<1x2xf32, #tpu.memory_space<vmem>>, %arg9: memref<8x16xf32, #tpu.memory_space<vmem>>, %arg10: memref<1x16xf32, #tpu.memory_space<vmem>>, %arg11: memref<1x16x16xf32, #tpu.memory_space<vmem>>, %arg12: memref<1x1x16xf32, #tpu.memory_space<vmem>>, %arg13: memref<20x2xf32, #tpu.memory_space<vmem>>, %arg14: memref<16x3xf32, #tpu.memory_space<vmem>>, %arg15: memref<1x3xf32, #tpu.memory_space<vmem>>, %arg16: memref<2x3xf32, #tpu.memory_space<vmem>>) attributes {dimension_semantics = [], scalar_prefetch = 0 : i64, scratch_operands = 0 : i64, tpu.core_type = #tpu.core_type<tc>} {
    %c0 = arith.constant 0 : index
    %c0_0 = arith.constant 0 : index
    %0 = vector.load %arg2[%c0, %c0_0] : memref<40x20xf32, #tpu.memory_space<vmem>>, vector<40x20xf32>
    %c0_1 = arith.constant 0 : index
    %c0_2 = arith.constant 0 : index
    %1 = vector.load %arg3[%c0_1, %c0_2] : memref<40x20xf32, #tpu.memory_space<vmem>>, vector<40x20xf32>
    %c0_3 = arith.constant 0 : index
    %c0_4 = arith.constant 0 : index
    %2 = vector.load %arg4[%c0_3, %c0_4] : memref<20x40xf32, #tpu.memory_space<vmem>>, vector<20x40xf32>
    %c0_5 = arith.constant 0 : index
    %c0_6 = arith.constant 0 : index
    %3 = vector.load %arg1[%c0_5, %c0_6] : memref<40x4xf32, #tpu.memory_space<vmem>>, vector<40x4xf32>
    %c0_7 = arith.constant 0 : index
    %c0_8 = arith.constant 0 : index
    %4 = vector.load %arg5[%c0_7, %c0_8] : memref<4x8xf32, #tpu.memory_space<vmem>>, vector<4x8xf32>
    %cst = arith.constant dense<0.000000e+00> : vector<40x8xf32>
    %5 = tpu.matmul %3, %4, %cst {dimension_numbers = #tpu.dot_dimension_numbers<[1], [0], [0], [1], [0, 0, 1, 1], [], []>} : vector<40x4xf32>, vector<4x8xf32>, vector<40x8xf32> -> vector<40x8xf32>
    %c0_9 = arith.constant 0 : index
    %c0_10 = arith.constant 0 : index
    %6 = vector.load %arg6[%c0_9, %c0_10] : memref<1x8xf32, #tpu.memory_space<vmem>>, vector<1x8xf32>
    %7 = vector.broadcast %6 : vector<1x8xf32> to vector<40x8xf32>
    %8 = arith.addf %5, %7 : vector<40x8xf32>
    %cst_11 = arith.constant 0.000000e+00 : f32
    %9 = vector.broadcast %cst_11 : f32 to vector<40x8xf32>
    %10 = arith.maximumf %8, %9 : vector<40x8xf32>
    %c0_12 = arith.constant 0 : index
    %c0_13 = arith.constant 0 : index
    %11 = vector.load %arg7[%c0_12, %c0_13] : memref<8x2xf32, #tpu.memory_space<vmem>>, vector<8x2xf32>
    %cst_14 = arith.constant dense<0.000000e+00> : vector<40x2xf32>
    %12 = tpu.matmul %10, %11, %cst_14 {dimension_numbers = #tpu.dot_dimension_numbers<[1], [0], [0], [1], [0, 0, 1, 1], [], []>} : vector<40x8xf32>, vector<8x2xf32>, vector<40x2xf32> -> vector<40x2xf32>
    %c0_15 = arith.constant 0 : index
    %c0_16 = arith.constant 0 : index
    %13 = vector.load %arg8[%c0_15, %c0_16] : memref<1x2xf32, #tpu.memory_space<vmem>>, vector<1x2xf32>
    %14 = vector.broadcast %13 : vector<1x2xf32> to vector<40x2xf32>
    %15 = arith.addf %12, %14 : vector<40x2xf32>
    %16 = arith.negf %15 : vector<40x2xf32>
    %17 = math.exp %16 : vector<40x2xf32>
    %cst_17 = arith.constant 1.000000e+00 : f32
    %18 = vector.broadcast %cst_17 : f32 to vector<40x2xf32>
    %19 = arith.addf %18, %17 : vector<40x2xf32>
    %20 = arith.divf %18, %19 : vector<40x2xf32>
    %cst_18 = arith.constant dense<0.000000e+00> : vector<20x2xf32>
    %21 = tpu.matmul %2, %20, %cst_18 {dimension_numbers = #tpu.dot_dimension_numbers<[1], [0], [0], [1], [0, 0, 1, 1], [], []>} : vector<20x40xf32>, vector<40x2xf32>, vector<20x2xf32> -> vector<20x2xf32>
    %cst_19 = arith.constant 1.000000e+00 : f32
    %22 = vector.broadcast %cst_19 : f32 to vector<20x2xf32>
    %23 = arith.addf %21, %22 : vector<20x2xf32>
    %cst_20 = arith.constant 0.000000e+00 : f32
    %24 = vector.broadcast %cst_20 : f32 to vector<20x2xf32>
    %25 = arith.cmpf ogt, %23, %24 : vector<20x2xf32>
    %26 = math.rsqrt %23 : vector<20x2xf32>
    %cst_21 = arith.constant 0.000000e+00 : f32
    %27 = vector.broadcast %cst_21 : f32 to vector<20x2xf32>
    %28 = arith.select %25, %26, %27 : vector<20x2xi1>, vector<20x2xf32>
    %cst_22 = arith.constant dense<0.000000e+00> : vector<40x2xf32>
    %29 = tpu.matmul %0, %28, %cst_22 {dimension_numbers = #tpu.dot_dimension_numbers<[1], [0], [0], [1], [0, 0, 1, 1], [], []>} : vector<40x20xf32>, vector<20x2xf32>, vector<40x2xf32> -> vector<40x2xf32>
    %cst_23 = arith.constant dense<0.000000e+00> : vector<40x2xf32>
    %30 = tpu.matmul %1, %28, %cst_23 {dimension_numbers = #tpu.dot_dimension_numbers<[1], [0], [0], [1], [0, 0, 1, 1], [], []>} : vector<40x20xf32>, vector<20x2xf32>, vector<40x2xf32> -> vector<40x2xf32>
    %31 = arith.mulf %29, %20 : vector<40x2xf32>
    %32 = arith.mulf %31, %30 : vector<40x2xf32>
    %33 = arith.mulf %28, %28 : vector<20x2xf32>
    %c0_24 = arith.constant 0 : index
    %c0_25 = arith.constant 0 : index
    %34 = vector.load %arg0[%c0_24, %c0_25] : memref<20x8xf32, #tpu.memory_space<vmem>>, vector<20x8xf32>
    %c0_26 = arith.constant 0 : index
    %c0_27 = arith.constant 0 : index
    %35 = vector.load %arg9[%c0_26, %c0_27] : memref<8x16xf32, #tpu.memory_space<vmem>>, vector<8x16xf32>
    %c0_28 = arith.constant 0 : index
    %c0_29 = arith.constant 0 : index
    %36 = vector.load %arg10[%c0_28, %c0_29] : memref<1x16xf32, #tpu.memory_space<vmem>>, vector<1x16xf32>
    %cst_30 = arith.constant dense<0.000000e+00> : vector<20x16xf32>
    %37 = tpu.matmul %34, %35, %cst_30 {dimension_numbers = #tpu.dot_dimension_numbers<[1], [0], [0], [1], [0, 0, 1, 1], [], []>} : vector<20x8xf32>, vector<8x16xf32>, vector<20x16xf32> -> vector<20x16xf32>
    %cst_31 = arith.constant dense<0.000000e+00> : vector<40x16xf32>
    %38 = tpu.matmul %0, %37, %cst_31 {dimension_numbers = #tpu.dot_dimension_numbers<[1], [0], [0], [1], [0, 0, 1, 1], [], []>} : vector<40x20xf32>, vector<20x16xf32>, vector<40x16xf32> -> vector<40x16xf32>
    %39 = vector.extract_strided_slice %32 {offsets = [0, 0], sizes = [40, 1], strides = [1, 1]} : vector<40x2xf32> to vector<40x1xf32>
    %40 = vector.broadcast %39 : vector<40x1xf32> to vector<40x16xf32>
    %41 = arith.mulf %38, %40 : vector<40x16xf32>
    %cst_32 = arith.constant dense<0.000000e+00> : vector<20x16xf32>
    %42 = tpu.matmul %2, %41, %cst_32 {dimension_numbers = #tpu.dot_dimension_numbers<[1], [0], [0], [1], [0, 0, 1, 1], [], []>} : vector<20x40xf32>, vector<40x16xf32>, vector<20x16xf32> -> vector<20x16xf32>
    %43 = vector.extract_strided_slice %33 {offsets = [0, 0], sizes = [20, 1], strides = [1, 1]} : vector<20x2xf32> to vector<20x1xf32>
    %44 = vector.broadcast %43 : vector<20x1xf32> to vector<20x16xf32>
    %45 = arith.mulf %44, %37 : vector<20x16xf32>
    %46 = arith.addf %42, %45 : vector<20x16xf32>
    %47 = vector.broadcast %36 : vector<1x16xf32> to vector<20x16xf32>
    %48 = arith.addf %46, %47 : vector<20x16xf32>
    %cst_33 = arith.constant dense<0.000000e+00> : vector<16xf32>
    %49 = vector.multi_reduction <add>, %48, %cst_33 [0] : vector<20x16xf32> to vector<16xf32>
    %50 = vector.shape_cast %49 : vector<16xf32> to vector<1x16xf32>
    %cst_34 = arith.constant 2.000000e+01 : f32
    %51 = vector.broadcast %cst_34 : f32 to vector<1x16xf32>
    %52 = arith.divf %50, %51 : vector<1x16xf32>
    %53 = vector.broadcast %52 : vector<1x16xf32> to vector<20x16xf32>
    %54 = arith.subf %48, %53 : vector<20x16xf32>
    %55 = arith.mulf %54, %54 : vector<20x16xf32>
    %cst_35 = arith.constant dense<0.000000e+00> : vector<16xf32>
    %56 = vector.multi_reduction <add>, %55, %cst_35 [0] : vector<20x16xf32> to vector<16xf32>
    %57 = vector.shape_cast %56 : vector<16xf32> to vector<1x16xf32>
    %cst_36 = arith.constant 2.000000e+01 : f32
    %58 = vector.broadcast %cst_36 : f32 to vector<1x16xf32>
    %59 = arith.divf %57, %58 : vector<1x16xf32>
    %60 = vector.broadcast %52 : vector<1x16xf32> to vector<20x16xf32>
    %61 = arith.subf %48, %60 : vector<20x16xf32>
    %cst_37 = arith.constant 9.99999974E-6 : f32
    %62 = vector.broadcast %cst_37 : f32 to vector<1x16xf32>
    %63 = arith.addf %59, %62 : vector<1x16xf32>
    %64 = math.rsqrt %63 : vector<1x16xf32>
    %65 = vector.broadcast %64 : vector<1x16xf32> to vector<20x16xf32>
    %66 = arith.mulf %61, %65 : vector<20x16xf32>
    %cst_38 = arith.constant 0.000000e+00 : f32
    %67 = vector.broadcast %cst_38 : f32 to vector<20x16xf32>
    %68 = arith.maximumf %66, %67 : vector<20x16xf32>
    %c0_39 = arith.constant 0 : index
    %c0_40 = arith.constant 0 : index
    %c0_41 = arith.constant 0 : index
    %69 = vector.load %arg11[%c0_39, %c0_40, %c0_41] : memref<1x16x16xf32, #tpu.memory_space<vmem>>, vector<1x16x16xf32>
    %70 = vector.shape_cast %69 : vector<1x16x16xf32> to vector<16x16xf32>
    %c0_42 = arith.constant 0 : index
    %c0_43 = arith.constant 0 : index
    %c0_44 = arith.constant 0 : index
    %71 = vector.load %arg12[%c0_42, %c0_43, %c0_44] : memref<1x1x16xf32, #tpu.memory_space<vmem>>, vector<1x1x16xf32>
    %72 = vector.shape_cast %71 : vector<1x1x16xf32> to vector<1x16xf32>
    %cst_45 = arith.constant dense<0.000000e+00> : vector<20x16xf32>
    %73 = tpu.matmul %68, %70, %cst_45 {dimension_numbers = #tpu.dot_dimension_numbers<[1], [0], [0], [1], [0, 0, 1, 1], [], []>} : vector<20x16xf32>, vector<16x16xf32>, vector<20x16xf32> -> vector<20x16xf32>
    %cst_46 = arith.constant dense<0.000000e+00> : vector<40x16xf32>
    %74 = tpu.matmul %0, %73, %cst_46 {dimension_numbers = #tpu.dot_dimension_numbers<[1], [0], [0], [1], [0, 0, 1, 1], [], []>} : vector<40x20xf32>, vector<20x16xf32>, vector<40x16xf32> -> vector<40x16xf32>
    %75 = vector.extract_strided_slice %32 {offsets = [0, 1], sizes = [40, 1], strides = [1, 1]} : vector<40x2xf32> to vector<40x1xf32>
    %76 = vector.broadcast %75 : vector<40x1xf32> to vector<40x16xf32>
    %77 = arith.mulf %74, %76 : vector<40x16xf32>
    %cst_47 = arith.constant dense<0.000000e+00> : vector<20x16xf32>
    %78 = tpu.matmul %2, %77, %cst_47 {dimension_numbers = #tpu.dot_dimension_numbers<[1], [0], [0], [1], [0, 0, 1, 1], [], []>} : vector<20x40xf32>, vector<40x16xf32>, vector<20x16xf32> -> vector<20x16xf32>
    %79 = vector.extract_strided_slice %33 {offsets = [0, 1], sizes = [20, 1], strides = [1, 1]} : vector<20x2xf32> to vector<20x1xf32>
    %80 = vector.broadcast %79 : vector<20x1xf32> to vector<20x16xf32>
    %81 = arith.mulf %80, %73 : vector<20x16xf32>
    %82 = arith.addf %78, %81 : vector<20x16xf32>
    %83 = vector.broadcast %72 : vector<1x16xf32> to vector<20x16xf32>
    %84 = arith.addf %82, %83 : vector<20x16xf32>
    %85 = arith.addf %84, %48 : vector<20x16xf32>
    %cst_48 = arith.constant 0.000000e+00 : f32
    %86 = vector.broadcast %cst_48 : f32 to vector<20x16xf32>
    %87 = arith.maximumf %85, %86 : vector<20x16xf32>
    %c0_49 = arith.constant 0 : index
    %c0_50 = arith.constant 0 : index
    %88 = vector.load %arg13[%c0_49, %c0_50] : memref<20x2xf32, #tpu.memory_space<vmem>>, vector<20x2xf32>
    %c0_51 = arith.constant 0 : index
    %c0_52 = arith.constant 0 : index
    %89 = vector.load %arg14[%c0_51, %c0_52] : memref<16x3xf32, #tpu.memory_space<vmem>>, vector<16x3xf32>
    %c0_53 = arith.constant 0 : index
    %c0_54 = arith.constant 0 : index
    %90 = vector.load %arg15[%c0_53, %c0_54] : memref<1x3xf32, #tpu.memory_space<vmem>>, vector<1x3xf32>
    %91 = vector.extract_strided_slice %88 {offsets = [0, 0], sizes = [20, 1], strides = [1, 1]} : vector<20x2xf32> to vector<20x1xf32>
    %92 = vector.broadcast %91 : vector<20x1xf32> to vector<20x16xf32>
    %93 = arith.mulf %87, %92 : vector<20x16xf32>
    %cst_55 = arith.constant dense<0xFF800000> : vector<16xf32>
    %94 = vector.multi_reduction <maximumf>, %93, %cst_55 [0] : vector<20x16xf32> to vector<16xf32>
    %95 = vector.shape_cast %94 : vector<16xf32> to vector<1x16xf32>
    %cst_56 = arith.constant dense<0.000000e+00> : vector<1x3xf32>
    %96 = tpu.matmul %95, %89, %cst_56 {dimension_numbers = #tpu.dot_dimension_numbers<[1], [0], [0], [1], [0, 0, 1, 1], [], []>} : vector<1x16xf32>, vector<16x3xf32>, vector<1x3xf32> -> vector<1x3xf32>
    %97 = arith.addf %96, %90 : vector<1x3xf32>
    %c0_57 = arith.constant 0 : index
    %c0_58 = arith.constant 0 : index
    %98 = vector.load %arg16[%c0_57, %c0_58] : memref<2x3xf32, #tpu.memory_space<vmem>>, vector<1x3xf32>
    tpu.vector_store %arg16[%c0_57, %c0_58], %97 {strides = array<i32>} : memref<2x3xf32, #tpu.memory_space<vmem>>, vector<1x3xf32>,
    %99 = vector.extract_strided_slice %88 {offsets = [0, 1], sizes = [20, 1], strides = [1, 1]} : vector<20x2xf32> to vector<20x1xf32>
    %100 = vector.broadcast %99 : vector<20x1xf32> to vector<20x16xf32>
    %101 = arith.mulf %87, %100 : vector<20x16xf32>
    %cst_59 = arith.constant dense<0xFF800000> : vector<16xf32>
    %102 = vector.multi_reduction <maximumf>, %101, %cst_59 [0] : vector<20x16xf32> to vector<16xf32>
    %103 = vector.shape_cast %102 : vector<16xf32> to vector<1x16xf32>
    %cst_60 = arith.constant dense<0.000000e+00> : vector<1x3xf32>
    %104 = tpu.matmul %103, %89, %cst_60 {dimension_numbers = #tpu.dot_dimension_numbers<[1], [0], [0], [1], [0, 0, 1, 1], [], []>} : vector<1x16xf32>, vector<16x3xf32>, vector<1x3xf32> -> vector<1x3xf32>
    %105 = arith.addf %104, %90 : vector<1x3xf32>
    %c1 = arith.constant 1 : index
    %c0_61 = arith.constant 0 : index
    %106 = vector.load %arg16[%c1, %c0_61] : memref<2x3xf32, #tpu.memory_space<vmem>>, vector<1x3xf32>
    tpu.vector_store %arg16[%c1, %c0_61], %105 {strides = array<i32>} : memref<2x3xf32, #tpu.memory_space<vmem>>, vector<1x3xf32>,
    return
  }
}

</mosaic_0001>

<bundles_post_ra>
// kernel: forward.1
= control target key start
LH: loop header
LB: loop body
LE: loop exit
PB: predicated region body
PF: predicated region fallthrough
CT: control target
= control target key end

     0   :  { %s2555_s0 = inlined_call_operand.vmem [shape: f32[20,8], index: 0, kind: input, shape index: {}]   ;;  %s2556_s1 = inlined_call_operand.vmem [shape: f32[40,4], index: 1, kind: input, shape index: {}]   ;;  %s2557_s2 = inlined_call_operand.vmem [shape: f32[40,20], index: 2, kind: input, shape index: {}]   ;;  %s2558_s3 = inlined_call_operand.vmem [shape: f32[40,20], index: 3, kind: input, shape index: {}]   ;;  %s2559_s4 = inlined_call_operand.vmem [shape: f32[20,40], index: 4, kind: input, shape index: {}]   ;;  %s2560_s5 = inlined_call_operand.vmem [shape: f32[4,8], index: 5, kind: input, shape index: {}]   ;;  %s2561_s6 = inlined_call_operand.vmem [shape: f32[1,8], index: 6, kind: input, shape index: {}]   ;;  %s2562_s7 = inlined_call_operand.vmem [shape: f32[8,2], index: 7, kind: input, shape index: {}]   ;;  %s2563_s8 = inlined_call_operand.vmem [shape: f32[1,2], index: 8, kind: input, shape index: {}]   ;;  %s2564_s9 = inlined_call_operand.vmem [shape: f32[8,16], index: 9, kind: input, shape index: {}]   ;;  %s2565_s10 = inlined_call_operand.vmem [shape: f32[1,16], index: 10, kind: input, shape index: {}]   ;;  %s2566_s11 = inlined_call_operand.vmem [shape: f32[1,16,16], index: 11, kind: input, shape index: {}]   ;;  %s2567_s12 = inlined_call_operand.vmem [shape: f32[1,1,16], index: 12, kind: input, shape index: {}]   ;;  %s2568_s13 = inlined_call_operand.vmem [shape: f32[20,2], index: 13, kind: input, shape index: {}]   ;;  %s2569_s14 = inlined_call_operand.vmem [shape: f32[16,3], index: 14, kind: input, shape index: {}]   ;;  %s2570_s15 = inlined_call_operand.vmem [shape: f32[1,3], index: 15, kind: input, shape index: {}]   ;;  %s2571_s16 = inlined_call_operand.hbm [shape: f32[2,3], index: 16, kind: output, shape index: {}]  }
   0x1   :  { %2573 = sst [smem:[#allocation5_spill]] %s2555_s0 }
   0x2   :  { %v72_v0 = vld [vmem:[%s2560_s5] sm:$0xf]  ;;  %vm96_vm0 = vcmask 1043456   ;;  %v2042_v2 = vmov 0.0   ;;  %vm2043_vm1 = vmmov 0   ;;  %vm80_vm2 = vcmask 31744  }
   0x3   :  { %v67_v1 = vld [vmem:[%s2556_s1] sm:$0xff]  ;;  %1722 = vmatprep.subr.mxu0 %v2042_v2  ;;  %1724 = vmatprep.mubr.msk.f32.mxu0 %vm2043_vm1, %v2042_v2 }
   0x4   :  { %1723 = vmatpush3.msk.msra.mxu0 %vm96_vm0, %v72_v0  ;;  %1739 = vmatprep.subr.mxu1 %v2042_v2 }
   0x5   :  { %21 = vsyncpa [#allocation3], 0  ;;  %1725 = vmatmul.mubr.msk.f32.vlgmr.msra.gmra.mrb[0].mxu0 %vm80_vm2, %v67_v1  ;;  %1741 = vmatprep.mubr.msk.f32.mxu1 %vm2043_vm1, %v2042_v2  ;;  %v68_v3 = vld [vmem:[%s2556_s1 + $0x8] sm:$0xff]  ;;  %v69_v4 = vld [vmem:[%s2556_s1 + $0x10] sm:$0xff]  ;;  %vm203_vm3 = vcmask 64512   ;;  %v2044_v29 = vmov 0.0|0.0  }
   0x6   :  { %1727 = vmatprep.mubr.msk.f32.mxu0 %vm2043_vm1, %v2042_v2  ;;  %v70_v5 = vld [vmem:[%s2556_s1 + $0x18] sm:$0xff]  ;;  %v71_v6 = vld [vmem:[%s2556_s1 + $0x20] sm:$0xff]  ;;  %1935 = vmatprep.subr.bf16.mxu0 %v2044_v29  ;;  %vm339_vm4 = vcmask 326656   ;;  %vm438_vm9 = vcmask 162816   ;;  %s2574_s25 = sld [smem:[#allocation5_spill]]  ;;  %vm989_vm10 = vcmask 130048  }
   0x7   :  { %v195_v7 = vld [vmem:[%s2562_s7] sm:$0xff]  ;;  %vm993_vm11 = vcmask 125952   ;;  %s2047_s23 = smov [#allocation2]   ;;  %vm1458_vm12 = vcmask 16384  }
   0x8   :  { %1740 = vmatpush3.msra.mxu1 %v195_v7  ;;  %v1574_v8 = vld [vmem:[%s2561_s6] ss:$0 sm:$0xff]  ;;  %v2238_v7 = vld [vmem:[%s2559_s4 + $0x10] sm:$0xf]  ;;  %s1566_s24 = sshll.u32 %s2047_s23, 4  ;;  %s1567_s24 = int_to_ptr.vmem [resolvable:$true] %s1566_s24 }
   0x9   :  { %1728 = vmatmul.mubr.msk.f32.gmra.mrb[2].mxu0 %vm80_vm2, %v68_v3  ;;  %1941 = vmatprep.subr.bf16.mxu1 %v2044_v29  ;;  %v1581_v30 = vld [vmem:[%s2563_s8] ss:$0 sm:$0xff]  ;;  %p2023_p1 = scmp.lt.s32.totalorder %s1567_s24, %s1567_s24 }
   0xa   :  { %1730 = vmatprep.mubr.msk.f32.mxu0 %vm2043_vm1, %v2042_v2 }
   0xd   :  { %1731 = vmatmul.mubr.msk.f32.gmra.mrb[4].mxu0 %vm80_vm2, %v69_v4 }
   0xe   :  { %1733 = vmatprep.mubr.msk.f32.mxu0 %vm2043_vm1, %v2042_v2 }
  0x11   :  { %1734 = vmatmul.mubr.msk.f32.gmra.mrb[6].mxu0 %vm80_vm2, %v70_v5  ;;  %v2218_v5 = vld [vmem:[%s2559_s4] sm:$0xff] }
  0x12   :  { %1736 = vmatprep.mubr.msk.f32.mxu0 %vm2043_vm1, %v2042_v2 }
  0x15   :  { %1737 = vmatmul.mubr.msk.f32.gmra.mrb[8].mxu0 %vm80_vm2, %v71_v6  ;;  %v2229_v6 = vld [vmem:[%s2559_s4 + $0x8] sm:$0xff]  ;;  %s2018_s4 = scalar_lea.vmem %s1567_s24, 32 }
  0x16   :  { %1766 = vmatprep.mubr.msk.f32.mxu0 %vm2043_vm1, %v2042_v2  ;;  %p2019_p0 = scmp.ne.s32.totalorder %s1567_s24, %s2018_s4  ;;  %p2024_p2 = scmp.lt.s32.totalorder %s2018_s4, %s2018_s4 }
  0x18   :  { %p2025_p3 = por %p2024_p2, %p2023_p1 }
  0x1a   :  { %p2026_p4 = pnand %p2025_p3, %p2019_p0 }
  0xd8   :  { %v166_v9 = vpop.f32.mrb[0].mxu0 }
  0xd9   :  { %v167_v10 = vadd.f32 %v1574_v8, %v166_v9  ;;  %v1726_v11 = vpop.f32.mrb[1].mxu0 }
  0xdb   :  { %v190_v12 = vmax.f32 %v167_v10, 0.0 }
  0xdc   :  { %v171_v13 = vpop.f32.mrb[2].mxu0 }
  0xdd   :  { %v172_v14 = vadd.f32 %v1574_v8, %v171_v13  ;;  %v1729_v15 = vpop.f32.mrb[3].mxu0  ;;  %1742 = vmatmul.mubr.msk.f32.vlgmr.msra.gmra.mrb[0].mxu1 %vm203_vm3, %v190_v12 }
  0xde   :  { %1744 = vmatprep.mubr.msk.f32.mxu1 %vm2043_vm1, %v2042_v2 }
  0xdf   :  { %v191_v16 = vmax.f32 %v172_v14, 0.0 }
  0xe0   :  { %v176_v17 = vpop.f32.mrb[4].mxu0 }
  0xe1   :  { %v177_v18 = vadd.f32 %v1574_v8, %v176_v17  ;;  %v1732_v19 = vpop.f32.mrb[5].mxu0  ;;  %1745 = vmatmul.mubr.msk.f32.gmra.mrb[2].mxu1 %vm203_vm3, %v191_v16 }
  0xe2   :  { %1747 = vmatprep.mubr.msk.f32.mxu1 %vm2043_vm1, %v2042_v2 }
  0xe3   :  { %v192_v20 = vmax.f32 %v177_v18, 0.0 }
  0xe4   :  { %v181_v21 = vpop.f32.mrb[6].mxu0 }
  0xe5   :  { %v182_v22 = vadd.f32 %v1574_v8, %v181_v21  ;;  %v1735_v23 = vpop.f32.mrb[7].mxu0  ;;  %1748 = vmatmul.mubr.msk.f32.gmra.mrb[4].mxu1 %vm203_vm3, %v192_v20 }
  0xe6   :  { %1750 = vmatprep.mubr.msk.f32.mxu1 %vm2043_vm1, %v2042_v2 }
  0xe7   :  { %v193_v24 = vmax.f32 %v182_v22, 0.0 }
  0xe8   :  { %v186_v25 = vpop.f32.mrb[8].mxu0 }
  0xe9   :  { %v187_v26 = vadd.f32 %v1574_v8, %v186_v25  ;;  %1751 = vmatmul.mubr.msk.f32.gmra.mrb[6].mxu1 %vm203_vm3, %v193_v24  ;;  %v1738_v27 = vpop.f32.mrb[9].mxu0  ;;  %v2255_v24 = vld [vmem:[%s2557_s2] sm:$0xff] }
  0xea   :  { %1753 = vmatprep.mubr.msk.f32.mxu1 %vm2043_vm1, %v2042_v2  ;;  %v59_v25 = vld [vmem:[%s2558_s3] sm:$0xff]  ;;  %v2275_v27 = vld [vmem:[%s2557_s2 + $0x8] sm:$0xff] }
  0xeb   :  { %v194_v28 = vmax.f32 %v187_v26, 0.0  ;;  %v668_v26 = vld [vmem:[%s2564_s9] sm:$0xff] }
  0xed   :  { %1754 = vmatmul.mubr.msk.f32.gmra.mrb[8].mxu1 %vm203_vm3, %v194_v28  ;;  %v60_v28 = vld [vmem:[%s2558_s3 + $0x8] sm:$0xff] }
  0xee   :  { %1781 = vmatprep.mubr.msk.f32.mxu1 %vm2043_vm1, %v2042_v2 }
 0x1b0   :  { %v285_v31 = vpop.f32.mrb[0].mxu1 }
 0x1b1   :  { %v286_v32 = vadd.f32 %v1581_v30, %v285_v31  ;;  %v1743_v33 = vpop.f32.mrb[1].mxu1  ;;  %v61_v31 = vld [vmem:[%s2558_s3 + $0x10] sm:$0xff] }
 0x1b2   :  { %v62_v33 = vld [vmem:[%s2558_s3 + $0x18] sm:$0xff] }
 0x1b3   :  { %v1587_v34 = vmul.f32 -1.442695, %v286_v32  ;;  %v2308_v32 = vld [vmem:[%s2557_s2 + $0x18] sm:$0xff] }
 0x1b4   :  { %v290_v35 = vpop.f32.mrb[2].mxu1 }
 0x1b5   :  { %1990 = vpow2.f32 %v1587_v34  ;;  %v291_v36 = vadd.f32 %v1581_v30, %v290_v35  ;;  %v1746_v37 = vpop.f32.mrb[3].mxu1  ;;  %v2323_v34 = vld [vmem:[%s2557_s2 + $0x20] sm:$0xff] }
 0x1b6   :  { %v63_v35 = vld [vmem:[%s2558_s3 + $0x20] sm:$0xff]  ;;  %v666_v37 = vld [vmem:[%s2574_s25 + $0x8] sm:$0xff] }
 0x1b7   :  { %v1588_v38 = vmul.f32 -1.442695, %v291_v36  ;;  %v665_v36 = vld [vmem:[%s2574_s25] sm:$0xff] }
 0x1b8   :  { %v295_v39 = vpop.f32.mrb[4].mxu1 }
 0x1b9   :  { %1992 = vpow2.f32 %v1588_v38  ;;  %v296_v40 = vadd.f32 %v1581_v30, %v295_v39  ;;  %v1749_v41 = vpop.f32.mrb[5].mxu1  ;;  %v667_v38 = vld [vmem:[%s2574_s25 + $0x10] sm:$0xf]  ;;  %v2045_v39 = vmov 0  }
 0x1ba   :  { %1982 = vset.pattern.permute.xlu0 %v2045_v39  ;;  %1983 = vset.pattern.permute.xlu1 %v2045_v39 }
 0x1bb   :  { %v1589_v42 = vmul.f32 -1.442695, %v296_v40 }
 0x1bc   :  { %v300_v43 = vpop.f32.mrb[6].mxu1 }
 0x1bd   :  { %1994 = vpow2.f32 %v1589_v42  ;;  %v301_v44 = vadd.f32 %v1581_v30, %v300_v43  ;;  %v1752_v45 = vpop.f32.mrb[7].mxu1 }
 0x1bf   :  { %v1991_v46 = vpop.eup %1990  ;;  %v1590_v47 = vmul.f32 -1.442695, %v301_v44 }
 0x1c0   :  { %v324_v48 = vadd.f32 1.0, %v1991_v46  ;;  %v305_v49 = vpop.f32.mrb[8].mxu1 }
 0x1c1   :  { %1996 = vpow2.f32 %v1590_v47  ;;  %v306_v50 = vadd.f32 %v1581_v30, %v305_v49  ;;  %v1755_v51 = vpop.f32.mrb[9].mxu1  ;;  %v2292_v30 = vld [vmem:[%s2557_s2 + $0x10] sm:$0xff] }
 0x1c2   :  { %1998 = vrcp.f32 %v324_v48 }
 0x1c3   :  { %v1993_v52 = vpop.eup %1992  ;;  %v1591_v53 = vmul.f32 -1.442695, %v306_v50 }
 0x1c4   :  { %v325_v54 = vadd.f32 1.0, %v1993_v52 }
 0x1c5   :  { %2000 = vpow2.f32 %v1591_v53 }
 0x1c6   :  { %2002 = vrcp.f32 %v325_v54 }
 0x1c7   :  { %v1995_v55 = vpop.eup %1994 }
 0x1c8   :  { %v326_v56 = vadd.f32 1.0, %v1995_v55 }
 0x1ca   :  { %2004 = vrcp.f32 %v326_v56 }
 0x1cb   :  { %v1997_v57 = vpop.eup %1996 }
 0x1cc   :  { %v327_v58 = vadd.f32 1.0, %v1997_v57  ;;  %v2199_v59 = vpop.eup %1998 }
 0x1ce   :  { %2006 = vrcp.f32 %v327_v58 }
 0x1cf   :  { %v2001_v60 = vpop.eup %2000 }
 0x1d0   :  { %v2201_v61 = vpop.eup %2002  ;;  %v328_v62 = vadd.f32 1.0, %v2001_v60 }
 0x1d1   :  { %v1936_v63 = vpack.c.bf16 %v2201_v61, %v2199_v59 }
 0x1d2   :  { %2008 = vrcp.f32 %v328_v62 }
 0x1d3   :  { %1937 = vmatpush3.bf16.msra.mxu0 %v1936_v63 }
 0x1d4   :  { %1938 = vmatprep.subr.bf16.mxu0 %v2044_v29  ;;  %v2206_v0 = vpop.eup %2004 }
 0x1d8   :  { %v2208_v1 = vpop.eup %2006 }
 0x1d9   :  { %v1939_v3 = vpack.c.bf16 %v2208_v1, %v2206_v0 }
 0x1db   :  { %1940 = vmatpush3.bf16.msra.mxu0 %v1939_v3 }
 0x1dc   :  { %v2212_v4 = vpop.eup %2008  ;;  %1764 = vmatprep.subr.mxu0 %v2042_v2 }
 0x1df   :  { %1765 = vmatpush3.msra.mxu0 %v2212_v4 }
 0x1e0   :  { %1767 = vmatmul.mubr.msk.f32.vlgmr.msra.gmra.mrb[10].mxu0 %vm339_vm4, %v2218_v5  ;;  %1945 = vmatprep.subr.bf16.mxu0 %v2044_v29 }
 0x1e1   :  { %1769 = vmatprep.mubr.msk.f32.mxu0 %vm2043_vm1, %v2042_v2 }
 0x1e4   :  { %1770 = vmatmul.mubr.msk.f32.gmra.mrb[12].mxu0 %vm339_vm4, %v2229_v6 }
 0x1e5   :  { %1772 = vmatprep.mubr.msk.f32.mxu0 %vm2043_vm1, %v2042_v2 }
 0x1e8   :  { %1773 = vmatmul.mubr.msk.f32.gmra.mrb[14].mxu0 %vm339_vm4, %v2238_v7 }
 0x1e9   :  { %1802 = vmatprep.mubr.msk.f32.mxu0 %vm2043_vm1, %v2042_v2 }
 0x2b3   :  { %v415_v8 = vpop.f32.mrb[10].mxu0 }
 0x2b4   :  { %v416_v9 = vadd.f32 1.0, %v415_v8  ;;  %v1768_v10 = vpop.f32.mrb[11].mxu0 }
 0x2b6   :  { %2010 = vrsqrt.f32 %v416_v9  ;;  %vm429_vm5 = vcmp.gt.f32.partialorder %v416_v9, 0.0 }
 0x2b7   :  { %v420_v11 = vpop.f32.mrb[12].mxu0 }
 0x2b8   :  { %v421_v12 = vadd.f32 1.0, %v420_v11  ;;  %v1771_v13 = vpop.f32.mrb[13].mxu0 }
 0x2ba   :  { %vm430_vm6 = vcmp.gt.f32.partialorder %v421_v12, 0.0  ;;  %2012 = vrsqrt.f32 %v421_v12 }
 0x2bb   :  { %vm1943_vm7 = vmpackc.low %vm430_vm6, %vm429_vm5  ;;  %v425_v14 = vpop.f32.mrb[14].mxu0 }
 0x2bc   :  { %v426_v15 = vadd.f32 1.0, %v425_v14  ;;  %v1774_v16 = vpop.f32.mrb[15].mxu0 }
 0x2be   :  { %2014 = vrsqrt.f32 %v426_v15  ;;  %vm431_vm8 = vcmp.gt.f32.partialorder %v426_v15, 0.0 }
 0x2c0   :  { %v2011_v17 = vpop.eup %2010 }
 0x2c1   :  { %v2244_v18 = vsel %vm429_vm5, %v2011_v17, 0.0 }
 0x2c4   :  { %v2013_v19 = vpop.eup %2012 }
 0x2c5   :  { %v2246_v20 = vsel %vm430_vm6, %v2013_v19, 0.0  ;;  %v1942_v21 = vpack.c.bf16 %v2013_v19, %v2011_v17  ;;  %v2046_v19 = vmov 1  }
 0x2c6   :  { %v663_v14 = vmul.f32 %v2246_v20, %v2246_v20 }
 0x2c7   :  { %1944 = vmatpush3.bf16.msk.msra.mxu1 %vm1943_vm7, %v1942_v21  ;;  %1948 = vmatpush3.bf16.msk.msra.mxu0 %vm1943_vm7, %v1942_v21 }
 0x2c8   :  { %v2015_v22 = vpop.eup %2014  ;;  %1779 = vmatprep.subr.mxu1 %v2042_v2  ;;  %1800 = vmatprep.subr.mxu0 %v2042_v2 }
 0x2c9   :  { %v2250_v23 = vsel %vm431_vm8, %v2015_v22, 0.0 }
 0x2ca   :  { %v664_v15 = vmul.f32 %v2250_v23, %v2250_v23 }
 0x2cb   :  { %1780 = vmatpush3.msk.msra.mxu1 %vm96_vm0, %v2250_v23  ;;  %1801 = vmatpush3.msk.msra.mxu0 %vm96_vm0, %v2250_v23 }
 0x2cc   :  { %1782 = vmatmul.mubr.msk.f32.vlgmr.msra.gmra.mrb[10].mxu1 %vm438_vm9, %v2255_v24  ;;  %1803 = vmatmul.mubr.msk.f32.vlgmr.msra.gmra.mrb[16].mxu0 %vm438_vm9, %v59_v25 }
 0x2cd   :  { %1784 = vmatprep.mubr.msk.f32.mxu1 %vm2043_vm1, %v2042_v2  ;;  %1805 = vmatprep.mubr.msk.f32.mxu0 %vm2043_vm1, %v2042_v2 }
 0x2ce   :  { %1817 = vmatprep.subr.mxu1 %v2042_v2  ;;  %1949 = vmatprep.subr.bf16.mxu0 %v2044_v29 }
 0x2cf   :  { %1818 = vmatpush3.msra.mxu1 %v668_v26 }
 0x2d0   :  { %1785 = vmatmul.mubr.msk.f32.gmra.mrb[12].mxu1 %vm438_vm9, %v2275_v27  ;;  %1806 = vmatmul.mubr.msk.f32.gmra.mrb[18].mxu0 %vm438_vm9, %v60_v28 }
 0x2d1   :  { %1787 = vmatprep.mubr.msk.f32.mxu1 %vm2043_vm1, %v2042_v2  ;;  %1808 = vmatprep.mubr.msk.f32.mxu0 %vm2043_vm1, %v2042_v2 }
 0x2d2   :  { %1952 = vmatprep.subr.bf16.mxu1 %v2044_v29 }
 0x2d4   :  { %1788 = vmatmul.mubr.msk.f32.gmra.mrb[14].mxu1 %vm438_vm9, %v2292_v30  ;;  %1809 = vmatmul.mubr.msk.f32.gmra.mrb[20].mxu0 %vm438_vm9, %v61_v31 }
 0x2d5   :  { %1790 = vmatprep.mubr.msk.f32.mxu1 %vm2043_vm1, %v2042_v2  ;;  %1811 = vmatprep.mubr.msk.f32.mxu0 %vm2043_vm1, %v2042_v2 }
 0x2d8   :  { %1791 = vmatmul.mubr.msk.f32.gmra.mrb[16].mxu1 %vm438_vm9, %v2308_v32  ;;  %1812 = vmatmul.mubr.msk.f32.gmra.mrb[22].mxu0 %vm438_vm9, %v62_v33 }
 0x2d9   :  { %1793 = vmatprep.mubr.msk.f32.mxu1 %vm2043_vm1, %v2042_v2  ;;  %1814 = vmatprep.mubr.msk.f32.mxu0 %vm2043_vm1, %v2042_v2 }
 0x2dc   :  { %1794 = vmatmul.mubr.msk.f32.gmra.mrb[18].mxu1 %vm438_vm9, %v2323_v34  ;;  %1815 = vmatmul.mubr.msk.f32.gmra.mrb[24].mxu0 %vm438_vm9, %v63_v35 }
 0x2dd   :  { %1819 = vmatprep.mubr.msk.f32.mxu1 %vm2043_vm1, %v2042_v2  ;;  %1834 = vmatprep.mubr.msk.f32.mxu0 %vm2043_vm1, %v2042_v2 }
 0x2e0   :  { %1820 = vmatmul.mubr.msk.f32.vlgmr.msra.gmra.mrb[20].mxu1 %vm203_vm3, %v665_v36 }
 0x2e1   :  { %1822 = vmatprep.mubr.msk.f32.mxu1 %vm2043_vm1, %v2042_v2 }
 0x2e4   :  { %1823 = vmatmul.mubr.msk.f32.gmra.mrb[22].mxu1 %vm203_vm3, %v666_v37 }
 0x2e5   :  { %1825 = vmatprep.mubr.msk.f32.mxu1 %vm2043_vm1, %v2042_v2 }
 0x2e8   :  { %1826 = vmatmul.mubr.msk.f32.gmra.mrb[24].mxu1 %vm203_vm3, %v667_v38 }
 0x2e9   :  { %1859 = vmatprep.mubr.msk.f32.mxu1 %vm2043_vm1, %v2042_v2 }
 0x39f   :  { %v523_v40 = vpop.f32.mrb[10].mxu1  ;;  %v628_v41 = vpop.f32.mrb[16].mxu0 }
 0x3a0   :  { %v652_v42 = vmul.f32 %v2199_v59, %v523_v40  ;;  %v1783_v43 = vpop.f32.mrb[11].mxu1  ;;  %v1804_v44 = vpop.f32.mrb[17].mxu0 }
 0x3a2   :  { %v657_v45 = vmul.f32 %v652_v42, %v628_v41 }
 0x3a3   :  { %v528_v46 = vpop.f32.mrb[12].mxu1  ;;  %v633_v47 = vpop.f32.mrb[18].mxu0 }
 0x3a4   :  { %v653_v48 = vmul.f32 %v2201_v61, %v528_v46  ;;  %854 = vperm.xlu0 %1982, %v657_v45   ;;  %v1786_v49 = vpop.f32.mrb[13].mxu1  ;;  %v1807_v50 = vpop.f32.mrb[19].mxu0 }
 0x3a5   :  { %v1030_v49 = vld [vmem:[%s2566_s11] sm:$0xff]  ;;  %v1031_v50 = vld [vmem:[%s2566_s11 + $0x8] sm:$0xff] }
 0x3a6   :  { %v658_v51 = vmul.f32 %v653_v48, %v633_v47 }
 0x3a7   :  { %v533_v52 = vpop.f32.mrb[14].mxu1  ;;  %v638_v53 = vpop.f32.mrb[20].mxu0 }
 0x3a8   :  { %v654_v54 = vmul.f32 %v2206_v0, %v533_v52  ;;  %859 = vperm.xlu0 %1982, %v658_v51   ;;  %v1789_v55 = vpop.f32.mrb[15].mxu1  ;;  %v1810_v56 = vpop.f32.mrb[21].mxu0  ;;  %v662_v0 = vmul.f32 %v2244_v18, %v2244_v18 }
 0x3aa   :  { %v659_v57 = vmul.f32 %v654_v54, %v638_v53 }
 0x3ab   :  { %v538_v58 = vpop.f32.mrb[16].mxu1  ;;  %v643_v59 = vpop.f32.mrb[22].mxu0 }
 0x3ac   :  { %v655_v60 = vmul.f32 %v2208_v1, %v538_v58  ;;  %864 = vperm.xlu1 %1983, %v659_v57   ;;  %v1792_v62 = vpop.f32.mrb[17].mxu1  ;;  %v1813_v63 = vpop.f32.mrb[23].mxu0 }
 0x3ae   :  { %v660_v61 = vmul.f32 %v655_v60, %v643_v59  ;;  %v1623_v60 = vld [vmem:[%s2565_s10] ss:$0 sm:$0xff] }
 0x3af   :  { %v543_v3 = vpop.f32.mrb[18].mxu1  ;;  %v648_v8 = vpop.f32.mrb[24].mxu0 }
 0x3b0   :  { %v656_v9 = vmul.f32 %v2212_v4, %v543_v3  ;;  %869 = vperm.xlu1 %1983, %v660_v61   ;;  %v1795_v10 = vpop.f32.mrb[19].mxu1  ;;  %v1816_v11 = vpop.f32.mrb[25].mxu0 }
 0x3b2   :  { %v661_v12 = vmul.f32 %v656_v9, %v648_v8 }
 0x3b3   :  { %v2364_v13 = vpop.f32.mrb[20].mxu1 }
 0x3b4   :  { %884 = vperm.xlu1 %1983, %v662_v0   ;;  %874 = vperm.xlu0 %1982, %v661_v12   ;;  %v1821_v1 = vpop.f32.mrb[21].mxu1 }
 0x3b7   :  { %v2370_v16 = vpop.f32.mrb[22].mxu1 }
 0x3b8   :  { %v1950_v4 = vpack.c.bf16 %v2370_v16, %v2364_v13  ;;  %894 = vperm.xlu1 %1983, %v664_v15   ;;  %889 = vperm.xlu0 %1982, %v663_v14   ;;  %v1824_v17 = vpop.f32.mrb[23].mxu1 }
 0x3ba   :  { %1951 = vmatpush3.bf16.msra.mxu0 %v1950_v4 }
 0x3bb   :  { %v2374_v18 = vpop.f32.mrb[24].mxu1  ;;  %1832 = vmatprep.subr.mxu0 %v2042_v2 }
 0x3bc   :  { %1985 = vset.pattern.permute.xlu1 %v2046_v19  ;;  %1984 = vset.pattern.permute.xlu0 %v2046_v19  ;;  %v1827_v20 = vpop.f32.mrb[25].mxu1 }
 0x3bd   :  { %1220 = vperm.xlu1 %1985, %v658_v51   ;;  %1216 = vperm.xlu0 %1984, %v657_v45   ;;  %v1959_v51 = vpack.c.bf16 %v1031_v50, %v1030_v49 }
 0x3be   :  { %1833 = vmatpush3.msk.msra.mxu0 %vm96_vm0, %v2374_v18 }
 0x3bf   :  { %1835 = vmatmul.mubr.msk.f32.vlgmr.msra.gmra.mrb[26].mxu0 %vm438_vm9, %v2255_v24  ;;  %1961 = vmatprep.subr.bf16.mxu0 %v2044_v29 }
 0x3c0   :  { %1837 = vmatprep.mubr.msk.f32.mxu0 %vm2043_vm1, %v2042_v2 }
 0x3c1   :  { %1224 = vperm.xlu1 %1985, %v659_v57   ;;  %1228 = vperm.xlu0 %1984, %v660_v61  }
 0x3c3   :  { %1838 = vmatmul.mubr.msk.f32.gmra.mrb[28].mxu0 %vm438_vm9, %v2275_v27 }
 0x3c4   :  { %1840 = vmatprep.mubr.msk.f32.mxu0 %vm2043_vm1, %v2042_v2 }
 0x3c5   :  { %1232 = vperm.xlu1 %1985, %v661_v12   ;;  %1241 = vperm.xlu0 %1984, %v662_v0  }
 0x3c7   :  { %1841 = vmatmul.mubr.msk.f32.gmra.mrb[30].mxu0 %vm438_vm9, %v2292_v30 }
 0x3c8   :  { %1843 = vmatprep.mubr.msk.f32.mxu0 %vm2043_vm1, %v2042_v2 }
 0x3c9   :  { %1245 = vperm.xlu1 %1985, %v663_v14   ;;  %1249 = vperm.xlu0 %1984, %v664_v15  }
 0x3cb   :  { %1844 = vmatmul.mubr.msk.f32.gmra.mrb[32].mxu0 %vm438_vm9, %v2308_v32 }
 0x3cc   :  { %1846 = vmatprep.mubr.msk.f32.mxu0 %vm2043_vm1, %v2042_v2 }
 0x3cd   :  { %1986 = vset.pattern.permute.xlu1 %v2045_v39  ;;  %1987 = vset.pattern.permute.xlu0 %v2045_v39 }
 0x3cf   :  { %1847 = vmatmul.mubr.msk.f32.gmra.mrb[34].mxu0 %vm438_vm9, %v2323_v34 }
 0x3d0   :  { %1887 = vmatprep.mubr.msk.f32.mxu0 %vm2043_vm1, %v2042_v2 }
 0x423   :  { %v855_v21 = vpop.permute.xlu0 %854 }
 0x427   :  { %v860_v25 = vpop.permute.xlu0 %859 }
 0x42b   :  { %v865_v35 = vpop.permute.xlu1 %864 }
 0x42f   :  { %v870_v39 = vpop.permute.xlu1 %869 }
 0x433   :  { %v875_v47 = vpop.permute.xlu0 %874  ;;  %v885_v52 = vpop.permute.xlu1 %884 }
 0x434   :  { %v897_v53 = vmul.f32 %v885_v52, %v2364_v13 }
 0x437   :  { %v890_v54 = vpop.permute.xlu0 %889  ;;  %v895_v59 = vpop.permute.xlu1 %894 }
 0x438   :  { %v898_v58 = vmul.f32 %v890_v54, %v2370_v16  ;;  %v899_v3 = vmul.f32 %v895_v59, %v2374_v18 }
 0x492   :  { %v828_v22 = vpop.f32.mrb[26].mxu0 }
 0x493   :  { %v1836_v23 = vpop.f32.mrb[27].mxu0  ;;  %v877_v28 = vmul.f32 %v855_v21, %v828_v22 }
 0x496   :  { %v833_v26 = vpop.f32.mrb[28].mxu0 }
 0x497   :  { %v878_v31 = vmul.f32 %v860_v25, %v833_v26  ;;  %v1839_v33 = vpop.f32.mrb[29].mxu0 }
 0x499   :  { %v1953_v36 = vpack.c.bf16 %v878_v31, %v877_v28 }
 0x49a   :  { %v838_v37 = vpop.f32.mrb[30].mxu0 }
 0x49b   :  { %v1842_v38 = vpop.f32.mrb[31].mxu0  ;;  %1954 = vmatpush3.bf16.msra.mxu1 %v1953_v36  ;;  %v879_v41 = vmul.f32 %v865_v35, %v838_v37 }
 0x49c   :  { %1955 = vmatprep.subr.bf16.mxu1 %v2044_v29 }
 0x49e   :  { %v843_v40 = vpop.f32.mrb[32].mxu0 }
 0x49f   :  { %v880_v42 = vmul.f32 %v870_v39, %v843_v40  ;;  %v1845_v43 = vpop.f32.mrb[33].mxu0 }
 0x4a1   :  { %v1956_v44 = vpack.c.bf16 %v880_v42, %v879_v41 }
 0x4a2   :  { %v848_v45 = vpop.f32.mrb[34].mxu0 }
 0x4a3   :  { %1957 = vmatpush3.bf16.msra.mxu1 %v1956_v44  ;;  %v1848_v46 = vpop.f32.mrb[35].mxu0  ;;  %v881_v48 = vmul.f32 %v875_v47, %v848_v45 }
 0x4a4   :  { %1857 = vmatprep.subr.mxu1 %v2042_v2 }
 0x4a7   :  { %1858 = vmatpush3.msra.mxu1 %v881_v48 }
 0x4a8   :  { %1860 = vmatmul.mubr.msk.f32.vlgmr.msra.gmra.mrb[26].mxu1 %vm339_vm4, %v2218_v5  ;;  %1958 = vmatprep.subr.bf16.mxu1 %v2044_v29 }
 0x4a9   :  { %1862 = vmatprep.mubr.msk.f32.mxu1 %vm2043_vm1, %v2042_v2  ;;  %1960 = vmatpush3.bf16.msra.mxu1 %v1959_v51 }
 0x4aa   :  { %1964 = vmatprep.subr.bf16.mxu1 %v2044_v29 }
 0x4ac   :  { %1863 = vmatmul.mubr.msk.f32.gmra.mrb[28].mxu1 %vm339_vm4, %v2229_v6 }
 0x4ad   :  { %1865 = vmatprep.mubr.msk.f32.mxu1 %vm2043_vm1, %v2042_v2 }
 0x4b0   :  { %1866 = vmatmul.mubr.msk.f32.gmra.mrb[30].mxu1 %vm339_vm4, %v2238_v7 }
 0x4b1   :  { %1872 = vmatprep.mubr.msk.f32.mxu1 %vm2043_vm1, %v2042_v2 }
 0x57b   :  { %v966_v55 = vpop.f32.mrb[26].mxu1 }
 0x57c   :  { %v967_v56 = vadd.f32 %v966_v55, %v897_v53  ;;  %v1861_v57 = vpop.f32.mrb[27].mxu1 }
 0x57e   :  { %v2432_v8 = vadd.f32 %v1623_v60, %v967_v56 }
 0x57f   :  { %v971_v62 = vpop.f32.mrb[28].mxu1 }
 0x580   :  { %v972_v63 = vadd.f32 %v971_v62, %v898_v58  ;;  %v1864_v61 = vpop.f32.mrb[29].mxu1  ;;  %v990_v13 = vsel %vm989_vm10, %v2432_v8, 0.0 }
 0x581   :  { %v1221_v61 = vpop.permute.xlu1 %1220 }
 0x582   :  { %v2434_v9 = vadd.f32 %v1623_v60, %v972_v63 }
 0x583   :  { %v976_v10 = vpop.f32.mrb[30].mxu1 }
 0x584   :  { %v991_v11 = vsel %vm989_vm10, %v2434_v9, 0.0  ;;  %v977_v0 = vadd.f32 %v976_v10, %v899_v3  ;;  %v1867_v12 = vpop.f32.mrb[31].mxu1  ;;  %v1217_v3 = vpop.permute.xlu0 %1216 }
 0x585   :  { %v992_v14 = vadd.f32 %v991_v11, %v990_v13 }
 0x586   :  { %v2440_v1 = vadd.f32 %v1623_v60, %v977_v0 }
 0x588   :  { %v994_v15 = vsel %vm993_vm11, %v2440_v1, 0.0 }
 0x589   :  { %v995_v16 = vadd.f32 %v994_v15, %v992_v14 }
 0x58b   :  { %v996_v4 = vrot.slane %v995_v16, 4 }
 0x58d   :  { %v997_v17 = vadd.f32 %v996_v4, %v995_v16  ;;  %v1225_v16 = vpop.permute.xlu1 %1224  ;;  %v1229_v4 = vpop.permute.xlu0 %1228 }
 0x58f   :  { %v998_v18 = vrot.slane %v997_v17, 2 }
 0x591   :  { %v999_v20 = vadd.f32 %v998_v18, %v997_v17 }
 0x593   :  { %v1000_v21 = vrot.slane %v999_v20, 1 }
 0x595   :  { %v1001_v22 = vadd.f32 %v1000_v21, %v999_v20 }
 0x597   :  { %v1003_v23 = vmul.f32 0.05, %v1001_v22 }
 0x599   :  { %v1004_v25 = vsub.f32 %v2432_v8, %v1003_v23  ;;  %v1005_v26 = vsub.f32 %v2434_v9, %v1003_v23  ;;  %v1006_v28 = vsub.f32 %v2440_v1, %v1003_v23 }
 0x59b   :  { %v1007_v31 = vmul.f32 %v1004_v25, %v1004_v25  ;;  %v1008_v33 = vmul.f32 %v1005_v26, %v1005_v26  ;;  %v1009_v35 = vmul.f32 %v1006_v28, %v1006_v28 }
 0x59d   :  { %v1010_v36 = vsel %vm989_vm10, %v1007_v31, 0.0  ;;  %v1011_v37 = vsel %vm989_vm10, %v1008_v33, 0.0  ;;  %v1013_v39 = vsel %vm993_vm11, %v1009_v35, 0.0  ;;  %v1242_v31 = vpop.permute.xlu0 %1241 }
 0x59e   :  { %v1012_v38 = vadd.f32 %v1011_v37, %v1010_v36 }
 0x5a0   :  { %v1014_v40 = vadd.f32 %v1013_v39, %v1012_v38 }
 0x5a2   :  { %v1015_v41 = vrot.slane %v1014_v40, 4 }
 0x5a4   :  { %v1016_v42 = vadd.f32 %v1015_v41, %v1014_v40 }
 0x5a6   :  { %v1017_v43 = vrot.slane %v1016_v42, 2 }
 0x5a8   :  { %v1018_v44 = vadd.f32 %v1017_v43, %v1016_v42 }
 0x5aa   :  { %v1019_v45 = vrot.slane %v1018_v44, 1 }
 0x5ac   :  { %v1020_v46 = vadd.f32 %v1019_v45, %v1018_v44  ;;  %v1250_v45 = vpop.permute.xlu0 %1249 }
 0x5ae   :  { %v1021_v47 = vmul.f32 0.05, %v1020_v46 }
 0x5b0   :  { %v1022_v48 = vadd.f32 1e-05, %v1021_v47 }
 0x5b2   :  { %2016 = vrsqrt.f32 %v1022_v48 }
 0x5bc   :  { %v2017_v49 = vpop.eup %2016 }
 0x5bd   :  { %v1024_v50 = vmul.f32 %v2017_v49, %v1004_v25  ;;  %v1025_v52 = vmul.f32 %v2017_v49, %v1005_v26  ;;  %v1026_v54 = vmul.f32 %v2017_v49, %v1006_v28  ;;  %v1233_v25 = vpop.permute.xlu1 %1232 }
 0x5bf   :  { %v1027_v51 = vmax.f32 %v1024_v50, 0.0  ;;  %v1028_v53 = vmax.f32 %v1025_v52, 0.0  ;;  %v1029_v55 = vmax.f32 %v1026_v54, 0.0 }
 0x5c1   :  { %1873 = vmatmul.mubr.msk.f32.vlgmr.msra.gmra.mrb[32].mxu1 %vm989_vm10, %v1027_v51 }
 0x5c2   :  { %1875 = vmatprep.mubr.msk.f32.mxu1 %vm2043_vm1, %v2042_v2 }
 0x5c5   :  { %1876 = vmatmul.mubr.msk.f32.gmra.mrb[34].mxu1 %vm989_vm10, %v1028_v53 }
 0x5c6   :  { %1878 = vmatprep.mubr.msk.f32.mxu1 %vm2043_vm1, %v2042_v2 }
 0x5c9   :  { %1879 = vmatmul.mubr.msk.f32.gmra.mrb[36].mxu1 %vm989_vm10, %v1029_v55 }
 0x5ca   :  { %1912 = vmatprep.mubr.msk.f32.mxu1 %vm2043_vm1, %v2042_v2 }
 0x694   :  { %v2459_v56 = vpop.f32.mrb[32].mxu1 }
 0x695   :  { %v1874_v57 = vpop.f32.mrb[33].mxu1  ;;  %v1252_v35 = vmul.f32 %v1242_v31, %v2459_v56 }
 0x698   :  { %v2461_v58 = vpop.f32.mrb[34].mxu1 }
 0x699   :  { %v1962_v59 = vpack.c.bf16 %v2461_v58, %v2459_v56  ;;  %v1877_v60 = vpop.f32.mrb[35].mxu1 }
 0x69b   :  { %1963 = vmatpush3.bf16.msra.mxu0 %v1962_v59 }
 0x69c   :  { %v2465_v62 = vpop.f32.mrb[36].mxu1  ;;  %1885 = vmatprep.subr.mxu0 %v2042_v2 }
 0x69d   :  { %v1880_v63 = vpop.f32.mrb[37].mxu1  ;;  %v1254_v46 = vmul.f32 %v1250_v45, %v2465_v62 }
 0x69f   :  { %1886 = vmatpush3.msk.msra.mxu0 %vm96_vm0, %v2465_v62 }
 0x6a0   :  { %1888 = vmatmul.mubr.msk.f32.vlgmr.msra.gmra.mrb[36].mxu0 %vm438_vm9, %v2255_v24  ;;  %1973 = vmatprep.subr.bf16.mxu0 %v2044_v29  ;;  %v1350_v24 = vld [vmem:[%s2568_s13] sm:$0xff] }
 0x6a1   :  { %1890 = vmatprep.mubr.msk.f32.mxu0 %vm2043_vm1, %v2042_v2  ;;  %1358 = vperm.xlu1 %1986, %v1350_v24  }
 0x6a4   :  { %1891 = vmatmul.mubr.msk.f32.gmra.mrb[38].mxu0 %vm438_vm9, %v2275_v27  ;;  %v1351_v27 = vld [vmem:[%s2568_s13 + $0x8] sm:$0xff] }
 0x6a5   :  { %1893 = vmatprep.mubr.msk.f32.mxu0 %vm2043_vm1, %v2042_v2  ;;  %1363 = vperm.xlu0 %1987, %v1351_v27  }
 0x6a6   :  { %1988 = vset.pattern.permute.xlu1 %v2046_v19 }
 0x6a7   :  { %1461 = vperm.xlu1 %1988, %v1350_v24  }
 0x6a8   :  { %1894 = vmatmul.mubr.msk.f32.gmra.mrb[40].mxu0 %vm438_vm9, %v2292_v30  ;;  %v1352_v30 = vld [vmem:[%s2568_s13 + $0x10] sm:$0xf] }
 0x6a9   :  { %1896 = vmatprep.mubr.msk.f32.mxu0 %vm2043_vm1, %v2042_v2  ;;  %1368 = vperm.xlu0 %1987, %v1352_v30  }
 0x6ab   :  { %1465 = vperm.xlu1 %1988, %v1351_v27  }
 0x6ac   :  { %1897 = vmatmul.mubr.msk.f32.gmra.mrb[42].mxu0 %vm438_vm9, %v2308_v32 }
 0x6ad   :  { %1899 = vmatprep.mubr.msk.f32.mxu0 %vm2043_vm1, %v2042_v2  ;;  %1989 = vset.pattern.permute.xlu0 %v2046_v19 }
 0x6af   :  { %1469 = vperm.xlu1 %1988, %v1352_v30  }
 0x6b0   :  { %1900 = vmatmul.mubr.msk.f32.gmra.mrb[44].mxu0 %vm438_vm9, %v2323_v34 }
 0x6b1   :  { %1932 = vmatprep.mubr.msk.f32.mxu0 %vm2043_vm1, %v2042_v2 }
 0x724   :  { %v1364_v55 = vpop.permute.xlu0 %1363 }
 0x773   :  { %v1191_v32 = vpop.f32.mrb[36].mxu0 }
 0x774   :  { %v1889_v34 = vpop.f32.mrb[37].mxu0  ;;  %v1235_v11 = vmul.f32 %v1217_v3, %v1191_v32 }
 0x777   :  { %v1196_v10 = vpop.f32.mrb[38].mxu0 }
 0x778   :  { %v1236_v0 = vmul.f32 %v1221_v61, %v1196_v10  ;;  %v1892_v12 = vpop.f32.mrb[39].mxu0  ;;  %v1369_v61 = vpop.permute.xlu0 %1368 }
 0x77a   :  { %v1965_v13 = vpack.c.bf16 %v1236_v0, %v1235_v11 }
 0x77b   :  { %v1201_v14 = vpop.f32.mrb[40].mxu0 }
 0x77c   :  { %1966 = vmatpush3.bf16.msra.mxu1 %v1965_v13  ;;  %v1895_v15 = vpop.f32.mrb[41].mxu0  ;;  %v1237_v19 = vmul.f32 %v1225_v16, %v1201_v14 }
 0x77d   :  { %1967 = vmatprep.subr.bf16.mxu1 %v2044_v29 }
 0x77f   :  { %v1206_v17 = vpop.f32.mrb[42].mxu0 }
 0x780   :  { %v1238_v18 = vmul.f32 %v1229_v4, %v1206_v17  ;;  %v1898_v20 = vpop.f32.mrb[43].mxu0 }
 0x782   :  { %v1968_v21 = vpack.c.bf16 %v1238_v18, %v1237_v19 }
 0x783   :  { %v1211_v22 = vpop.f32.mrb[44].mxu0 }
 0x784   :  { %1969 = vmatpush3.bf16.msra.mxu1 %v1968_v21  ;;  %v1901_v23 = vpop.f32.mrb[45].mxu0  ;;  %v1239_v26 = vmul.f32 %v1233_v25, %v1211_v22  ;;  %v1355_v25 = vld [vmem:[%s2570_s15] sm:$0x1] }
 0x785   :  { %1910 = vmatprep.subr.mxu1 %v2042_v2 }
 0x788   :  { %1911 = vmatpush3.msra.mxu1 %v1239_v26 }
 0x789   :  { %1913 = vmatmul.mubr.msk.f32.vlgmr.msra.gmra.mrb[38].mxu1 %vm339_vm4, %v2218_v5  ;;  %1970 = vmatprep.subr.bf16.mxu1 %v2044_v29  ;;  %v1353_v5 = vld [vmem:[%s2569_s14] sm:$0xff]  ;;  %v1354_v29 = vld [vmem:[%s2569_s14 + $0x8] sm:$0xff] }
 0x78a   :  { %1915 = vmatprep.mubr.msk.f32.mxu1 %vm2043_vm1, %v2042_v2  ;;  %v1971_v28 = vpack.c.bf16 %v1354_v29, %v1353_v5 }
 0x78c   :  { %1975 = vmatpush3.bf16.msra.mxu0 %v1971_v28  ;;  %1972 = vmatpush3.bf16.msra.mxu1 %v1971_v28 }
 0x78d   :  { %1916 = vmatmul.mubr.msk.f32.gmra.mrb[40].mxu1 %vm339_vm4, %v2229_v6  ;;  %v1246_v6 = vpop.permute.xlu1 %1245 }
 0x78e   :  { %1918 = vmatprep.mubr.msk.f32.mxu1 %vm2043_vm1, %v2042_v2  ;;  %v1253_v38 = vmul.f32 %v1246_v6, %v2461_v58 }
 0x791   :  { %1919 = vmatmul.mubr.msk.f32.gmra.mrb[42].mxu1 %vm339_vm4, %v2238_v7  ;;  %v1359_v33 = vpop.permute.xlu1 %1358 }
 0x792   :  { %1925 = vmatprep.mubr.msk.f32.mxu1 %vm2043_vm1, %v2042_v2  ;;  %v1636_v2 = vld [vmem:[%s2567_s12] ss:$0 sm:$0xff] }
 0x795   :  { %v1462_v41 = vpop.permute.xlu1 %1461 }
 0x799   :  { %v1466_v54 = vpop.permute.xlu1 %1465 }
 0x79d   :  { %v1470_v34 = vpop.permute.xlu1 %1469 }
 0x85c   :  { %v1321_v7 = vpop.f32.mrb[38].mxu1 }
 0x85d   :  { %v1322_v36 = vadd.f32 %v1321_v7, %v1252_v35  ;;  %v1914_v37 = vpop.f32.mrb[39].mxu1 }
 0x85f   :  { %v1341_v39 = vadd.f32 %v1636_v2, %v1322_v36 }
 0x860   :  { %v1326_v40 = vpop.f32.mrb[40].mxu1 }
 0x861   :  { %v1344_v42 = vadd.f32 %v1341_v39, %v2432_v8  ;;  %v1327_v43 = vadd.f32 %v1326_v40, %v1253_v38  ;;  %v1917_v44 = vpop.f32.mrb[41].mxu1 }
 0x863   :  { %v1347_v47 = vmax.f32 %v1344_v42, 0.0  ;;  %v1342_v48 = vadd.f32 %v1636_v2, %v1327_v43 }
 0x864   :  { %v1331_v49 = vpop.f32.mrb[42].mxu1 }
 0x865   :  { %v1332_v50 = vadd.f32 %v1331_v49, %v1254_v46  ;;  %v1345_v51 = vadd.f32 %v1342_v48, %v2434_v9  ;;  %v1920_v52 = vpop.f32.mrb[43].mxu1  ;;  %v1371_v53 = vmul.f32 %v1359_v33, %v1347_v47  ;;  %v1472_v56 = vmul.f32 %v1462_v41, %v1347_v47 }
 0x867   :  { %v1343_v57 = vadd.f32 %v1636_v2, %v1332_v50  ;;  %v1348_v58 = vmax.f32 %v1345_v51, 0.0  ;;  %v1374_v63 = vsel %vm989_vm10, %v1371_v53, -inf  ;;  %v1475_v62 = vsel %vm989_vm10, %v1472_v56, -inf }
 0x869   :  { %v1473_v59 = vmul.f32 %v1466_v54, %v1348_v58  ;;  %v1372_v8 = vmul.f32 %v1364_v55, %v1348_v58  ;;  %v1346_v60 = vadd.f32 %v1343_v57, %v2440_v1 }
 0x86b   :  { %v1476_v24 = vsel %vm989_vm10, %v1473_v59, -inf  ;;  %v1375_v27 = vsel %vm989_vm10, %v1372_v8, -inf  ;;  %v1349_v9 = vmax.f32 %v1346_v60, 0.0 }
 0x86c   :  { %v1478_v30 = vmax.f32 %v1475_v62, %v1476_v24  ;;  %v1377_v32 = vmax.f32 %v1374_v63, %v1375_v27 }
 0x86d   :  { %v1474_v3 = vmul.f32 %v1470_v34, %v1349_v9  ;;  %v1373_v10 = vmul.f32 %v1369_v61, %v1349_v9 }
 0x86f   :  { %v1477_v11 = vsel %vm993_vm11, %v1474_v3, -inf  ;;  %v1376_v0 = vsel %vm993_vm11, %v1373_v10, -inf }
 0x870   :  { %v1479_v1 = vmax.f32 %v1478_v30, %v1477_v11  ;;  %v1378_v12 = vmax.f32 %v1377_v32, %v1376_v0 }
 0x872   :  { %v1480_v13 = vrot.slane %v1479_v1, 4  ;;  %v1379_v14 = vrot.slane %v1378_v12, 4 }
 0x874   :  { %v1481_v15 = vmax.f32 %v1479_v1, %v1480_v13  ;;  %v1380_v16 = vmax.f32 %v1378_v12, %v1379_v14 }
 0x876   :  { %v1482_v4 = vrot.slane %v1481_v15, 2  ;;  %v1381_v17 = vrot.slane %v1380_v16, 2 }
 0x878   :  { %v1483_v19 = vmax.f32 %v1481_v15, %v1482_v4  ;;  %v1382_v18 = vmax.f32 %v1380_v16, %v1381_v17 }
 0x87a   :  { %v1484_v20 = vrot.slane %v1483_v19, 1  ;;  %v1383_v21 = vrot.slane %v1382_v18, 1 }
 0x87c   :  { %v1485_v22 = vmax.f32 %v1483_v19, %v1484_v20  ;;  %v1384_v23 = vmax.f32 %v1382_v18, %v1383_v21 }
 0x87e   :  { %1926 = vmatmul.mubr.msk.f32.vlgmr.msra.gmra.mrb[44].mxu1 %vm989_vm10, %v1384_v23  ;;  %1933 = vmatmul.mubr.msk.f32.vlgmr.msra.gmra.mrb[46].mxu0 %vm989_vm10, %v1485_v22 }
 0x951   :  { %v1454_v26 = vpop.f32.mrb[44].mxu1  ;;  %v1555_v5 = vpop.f32.mrb[46].mxu0 }
 0x952   :  { %v1455_v29 = vadd.f32 %v1454_v26, %v1355_v25  ;;  %v1556_v28 = vadd.f32 %v1555_v5, %v1355_v25  ;;  %v1927_v6 = vpop.f32.mrb[45].mxu1  ;;  %v1934_v31 = vpop.f32.mrb[47].mxu0 }
 0x954   :  { %1459 = vst.msk [vmem:[#allocation2] sm:$0x1] %vm1458_vm12, %v1455_v29  ;;  %1559 = vst.msk [vmem:[#allocation2 + $0x1] sm:$0x1] %vm1458_vm12, %v1556_v28 }
 0x955   :  { %2029 = shalt.err (!%p2026_p4)
}
 0x956   :  { %s2030_s25 = scalar_lea.hbm %s2571_s16, 32 }
 0x957   :  { %p2031_p5 = scmp.ne.s32.totalorder %s2571_s16, %s2030_s25  ;;  %p2034_p6 = scmp.lt.u32.totalorder %s2030_s25, %s2571_s16 }
 0x959   :  { %p2036_p7 = pnand %p2034_p6, %p2031_p5 }
 0x95b   :  { %2039 = shalt.err (!%p2036_p7)
}
 0x95c   :  { %1569 = dma.vmem_to_hbm [thread:$0]  %s1567_s24, 32, %s2571_s16, [#allocation3]  }
 0x95d   :  { %2040 = dma.done.wait [#allocation3], 32  }
 0x95e   :  { %2041 = vsyncadd [#allocation3], 4294967264 }
 0x95f   :  { %1573 = vsyncpa [#allocation3], 1 }

</bundles_post_ra>
